<compile_context>
chip_gen: v6e
topology: v6e:2x2x1
jax: 0.10.0
libtpu: 0.0.40
codegen_flags: <defaults>
</compile_context>

<pallas_src>
import functools

import jax
import jax.numpy as jnp
from jax.experimental import pallas as pl
from jax.experimental.pallas import tpu as pltpu

BN_EPS = 1e-5
LANE = 128  # TPU lane width; every piece / output block is padded to a multiple of this.


def _round_up(n, m):
    return ((n + m - 1) // m) * m


# ---------------------------------------------------------------------------
# Static layout of the "virtual concat" activation slab and the packed weights
# ---------------------------------------------------------------------------
def _layout(embedding_dim, gen_dims, data_dim):
    """Python-int offsets for the packed slabs (all static => free in-kernel slices)."""
    piece_w = [embedding_dim] + list(gen_dims)            # logical piece widths
    piece_p = [_round_up(w, LANE) for w in piece_w]       # 128-padded piece widths
    piece_off = [0]
    for p in piece_p:
        piece_off.append(piece_off[-1] + p)

    out_w = list(gen_dims) + [data_dim]                   # per-matmul logical out widths
    out_p = [_round_up(w, LANE) for w in out_w]           # 128-padded out widths
    col_off = [0]
    for p in out_p:
        col_off.append(col_off[-1] + p)

    return dict(piece_w=piece_w, piece_p=piece_p, piece_off=piece_off,
                out_w=out_w, out_p=out_p, col_off=col_off,
                k_total=piece_off[-1], c_total=col_off[-1], gb_w=max(out_p))


# ---------------------------------------------------------------------------
# Fused kernel (built per static network structure)
# ---------------------------------------------------------------------------
def _make_kernel(embedding_dim, gen_dims, data_dim, lay, w_dtype):
    num_layers = len(gen_dims)
    piece_p, piece_off = lay["piece_p"], lay["piece_off"]
    out_p, col_off = lay["out_p"], lay["col_off"]

    def kernel(x_ref, w_ref, gb_ref, out_ref, slab_ref):
        B = slab_ref.shape[0]
        inv_n = 1.0 / B

        # Seed piece 0 of the activation slab with x (pad lanes zeroed).
        if embedding_dim < piece_p[0]:
            slab_ref[:, 0:piece_p[0]] = jnp.zeros((B, piece_p[0]), jnp.float32)
        slab_ref[:, 0:embedding_dim] = x_ref[...]

        for l in range(num_layers):
            k = piece_off[l + 1]        # width of already-written pieces [x, y_0..y_{l-1}]
            col = col_off[l]            # this layer's column block in the weight slab
            ow = out_p[l]               # padded output width (multiple of 128)

            # Linear over the virtual concat: ONE matmul against the packed weight block
            # (rows already permuted/zero-padded at init).  Bias omitted: it is exactly
            # cancelled by the training-mode BatchNorm mean subtraction.
            lhs = slab_ref[:, 0:k].astype(w_dtype)
            acc = jnp.dot(lhs, w_ref[0:k, col:col + ow],
                          preferred_element_type=jnp.float32)

            # BatchNorm1d (training mode, biased batch variance), one-pass stats in f32.
            s1 = jnp.sum(acc, axis=0, keepdims=True)
            s2 = jnp.sum(acc * acc, axis=0, keepdims=True)
            mean = s1 * inv_n
            var = jnp.maximum(s2 * inv_n - mean * mean, 0.0)
            gamma = gb_ref[2 * l:2 * l + 1, 0:ow]
            beta = gb_ref[2 * l + 1:2 * l + 2, 0:ow]
            y = gamma * ((acc - mean) * jax.lax.rsqrt(var + BN_EPS)) + beta

            # ReLU (padded lanes remain exactly 0).
            y = jnp.maximum(y, 0.0)

            # "torch.cat([y, h])" = one lane-aligned, unmasked 128-wide store of the new
            # piece; existing pieces are never copied or moved.
            slab_ref[:, k:k + ow] = y

        # Final Linear over the full virtual concat (+ bias).
        k = piece_off[num_layers + 1]
        col = col_off[num_layers]
        ow = out_p[num_layers]
        lhs = slab_ref[:, 0:k].astype(w_dtype)
        acc = jnp.dot(lhs, w_ref[0:k, col:col + ow],
                      preferred_element_type=jnp.float32)
        bias = gb_ref[2 * num_layers:2 * num_layers + 1, 0:ow]
        out_ref[...] = (acc + bias)[:, 0:data_dim]

    return kernel


def _vmem_spec():
    return pl.BlockSpec(memory_space=pltpu.MemorySpace.VMEM)


@functools.partial(jax.jit, static_argnums=(0, 1, 2))
def _forward(embedding_dim, gen_dims, data_dim, w_slab, gb_slab, x):
    lay = _layout(embedding_dim, gen_dims, data_dim)
    B = x.shape[0]
    kernel = _make_kernel(embedding_dim, gen_dims, data_dim, lay, w_slab.dtype)
    return pl.pallas_call(
        kernel,
        out_shape=jax.ShapeDtypeStruct((B, data_dim), jnp.float32),
        in_specs=[_vmem_spec(), _vmem_spec(), _vmem_spec()],
        out_specs=_vmem_spec(),
        scratch_shapes=[pltpu.VMEM((B, lay["k_total"]), jnp.float32)],
    )(x, w_slab, gb_slab)


def generative_network_forward(params, x):
    """Single fused pallas_call for the whole GenerativeNetwork forward (3 input DMAs)."""
    return _forward(params["embedding_dim"], params["gen_dims"], params["data_dim"],
                    params["w_slab"], params["gb_slab"], x)


# ---------------------------------------------------------------------------
# Parameter setup (deterministic, in-script).  Packing happens ONCE here.
# ---------------------------------------------------------------------------
def init_params(key, embedding_dim, gen_dims, data_dim, w_dtype=jnp.float32):
    gen_dims = tuple(int(g) for g in gen_dims)
    num_layers = len(gen_dims)
    lay = _layout(embedding_dim, gen_dims, data_dim)
    piece_w, piece_off = lay["piece_w"], lay["piece_off"]
    col_off, gb_w = lay["col_off"], lay["gb_w"]

    w_slab = jnp.zeros((lay["k_total"], lay["c_total"]), jnp.float32)
    gb_rows = []
    ref_layers = []

    def scatter_rows(slab, w_torch, l, out_dim):
        # PyTorch concat order at layer l is [y_{l-1}, ..., y_0, x] = slab pieces l..0.
        col = col_off[l]
        r = 0
        for p in range(l, -1, -1):
            wp = piece_w[p]
            blk = w_torch[r:r + wp, :]
            slab = slab.at[piece_off[p]:piece_off[p] + wp, col:col + out_dim].set(blk)
            r += wp
        return slab

    for l, o in enumerate(gen_dims):
        in_dim = embedding_dim + sum(gen_dims[:l])
        key, kw, kb = jax.random.split(key, 3)
        bound = float(in_dim) ** -0.5
        w = jax.random.uniform(kw, (in_dim, o), jnp.float32, -bound, bound)
        b = jax.random.uniform(kb, (1, o), jnp.float32, -bound, bound)
        gamma = jnp.ones((1, o), jnp.float32)      # BatchNorm1d defaults
        beta = jnp.zeros((1, o), jnp.float32)
        ref_layers.append({"w": w, "b": b, "gamma": gamma, "beta": beta})

        w_slab = scatter_rows(w_slab, w, l, o)
        gb_rows.append(jnp.zeros((1, gb_w), jnp.float32).at[:, :o].set(gamma))
        gb_rows.append(jnp.zeros((1, gb_w), jnp.float32).at[:, :o].set(beta))

    in_dim = embedding_dim + sum(gen_dims)
    key, kw, kb = jax.random.split(key, 3)
    bound = float(in_dim) ** -0.5
    wf = jax.random.uniform(kw, (in_dim, data_dim), jnp.float32, -bound, bound)
    bf = jax.random.uniform(kb, (1, data_dim), jnp.float32, -bound, bound)
    w_slab = scatter_rows(w_slab, wf, num_layers, data_dim)
    gb_rows.append(jnp.zeros((1, gb_w), jnp.float32).at[:, :data_dim].set(bf))

    return {
        "embedding_dim": int(embedding_dim),
        "gen_dims": gen_dims,
        "data_dim": int(data_dim),
        "w_slab": w_slab.astype(w_dtype),               # one packed weight slab
        "gb_slab": jnp.concatenate(gb_rows, axis=0),    # (2L+1, 128) gammas/betas/bias
        # reference-only copies (unused by the kernel):
        "ref_layers": ref_layers,
        "ref_final_w": wf,
        "ref_final_b": bf,
    }


# ---------------------------------------------------------------------------
# Pure-JAX reference (mirrors the PyTorch module, including the linear biases)
# ---------------------------------------------------------------------------
def generative_network_reference(params, x):
    h = x
    for layer in params["ref_layers"]:
        y = h @ layer["w"] + layer["b"]
        mean = jnp.mean(y, axis=0, keepdims=True)
        var = jnp.mean((y - mean) ** 2, axis=0, keepdims=True)
        y = layer["gamma"] * (y - mean) / jnp.sqrt(var + BN_EPS) + layer["beta"]
        y = jnp.maximum(y, 0.0)
        h = jnp.concatenate([y, h], axis=1)
    return h @ params["ref_final_w"] + params["ref_final_b"]


# ---------------------------------------------------------------------------
if __name__ == "__main__":
    embedding_dim = 32
    gen_dims = (32, 32)
    data_dim = 16
    batch = 8

    key = jax.random.PRNGKey(0)
    key, kx = jax.random.split(key)
    x = jax.random.normal(kx, (batch, embedding_dim), jnp.float32)

    params = init_params(key, embedding_dim, gen_dims, data_dim)

    out = generative_network_forward(params, x)
    out = jax.block_until_ready(out)

    ref = generative_network_reference(params, x)
    assert out.shape == (batch, data_dim), out.shape
    assert jnp.allclose(out, ref, atol=1e-4, rtol=1e-4), (
        float(jnp.max(jnp.abs(out - ref)))
    )
    print("KERNEL_OK")
</pallas_src>

<mosaic_0001>
module attributes {stable_mosaic.version = 11 : i64} {
  func.func @kernel(%arg0: memref<8x32xf32, #tpu.memory_space<vmem>>, %arg1: memref<384x384xf32, #tpu.memory_space<vmem>>, %arg2: memref<5x128xf32, #tpu.memory_space<vmem>>, %arg3: memref<8x16xf32, #tpu.memory_space<vmem>>, %arg4: memref<8x384xf32, #tpu.memory_space<vmem>>) attributes {dimension_semantics = [], scalar_prefetch = 0 : i64, scratch_operands = 1 : i64, tpu.core_type = #tpu.core_type<tc>} {
    %cst = arith.constant 0.000000e+00 : f32
    %0 = vector.broadcast %cst : f32 to vector<8x128xf32>
    %c0 = arith.constant 0 : index
    %c0_0 = arith.constant 0 : index
    %1 = vector.load %arg4[%c0, %c0_0] : memref<8x384xf32, #tpu.memory_space<vmem>>, vector<8x128xf32>
    tpu.vector_store %arg4[%c0, %c0_0], %0 {strides = array<i32>} : memref<8x384xf32, #tpu.memory_space<vmem>>, vector<8x128xf32>,
    %c0_1 = arith.constant 0 : index
    %c0_2 = arith.constant 0 : index
    %2 = vector.load %arg0[%c0_1, %c0_2] : memref<8x32xf32, #tpu.memory_space<vmem>>, vector<8x32xf32>
    %c0_3 = arith.constant 0 : index
    %c0_4 = arith.constant 0 : index
    %3 = vector.load %arg4[%c0_3, %c0_4] : memref<8x384xf32, #tpu.memory_space<vmem>>, vector<8x32xf32>
    tpu.vector_store %arg4[%c0_3, %c0_4], %2 {strides = array<i32>} : memref<8x384xf32, #tpu.memory_space<vmem>>, vector<8x32xf32>,
    %c0_5 = arith.constant 0 : index
    %c0_6 = arith.constant 0 : index
    %4 = vector.load %arg4[%c0_5, %c0_6] : memref<8x384xf32, #tpu.memory_space<vmem>>, vector<8x128xf32>
    %c0_7 = arith.constant 0 : index
    %c0_8 = arith.constant 0 : index
    %5 = vector.load %arg1[%c0_7, %c0_8] : memref<384x384xf32, #tpu.memory_space<vmem>>, vector<128x128xf32>
    %cst_9 = arith.constant dense<0.000000e+00> : vector<8x128xf32>
    %6 = tpu.matmul %4, %5, %cst_9 {dimension_numbers = #tpu.dot_dimension_numbers<[1], [0], [0], [1], [0, 0, 1, 1], [], []>} : vector<8x128xf32>, vector<128x128xf32>, vector<8x128xf32> -> vector<8x128xf32>
    %cst_10 = arith.constant dense<0.000000e+00> : vector<128xf32>
    %7 = vector.multi_reduction <add>, %6, %cst_10 [0] : vector<8x128xf32> to vector<128xf32>
    %8 = vector.shape_cast %7 : vector<128xf32> to vector<1x128xf32>
    %9 = arith.mulf %6, %6 : vector<8x128xf32>
    %cst_11 = arith.constant dense<0.000000e+00> : vector<128xf32>
    %10 = vector.multi_reduction <add>, %9, %cst_11 [0] : vector<8x128xf32> to vector<128xf32>
    %11 = vector.shape_cast %10 : vector<128xf32> to vector<1x128xf32>
    %cst_12 = arith.constant 1.250000e-01 : f32
    %12 = vector.broadcast %cst_12 : f32 to vector<1x128xf32>
    %13 = arith.mulf %8, %12 : vector<1x128xf32>
    %cst_13 = arith.constant 1.250000e-01 : f32
    %14 = vector.broadcast %cst_13 : f32 to vector<1x128xf32>
    %15 = arith.mulf %11, %14 : vector<1x128xf32>
    %16 = arith.mulf %13, %13 : vector<1x128xf32>
    %17 = arith.subf %15, %16 : vector<1x128xf32>
    %cst_14 = arith.constant 0.000000e+00 : f32
    %18 = vector.broadcast %cst_14 : f32 to vector<1x128xf32>
    %19 = arith.maximumf %17, %18 : vector<1x128xf32>
    %c0_15 = arith.constant 0 : index
    %c0_16 = arith.constant 0 : index
    %20 = vector.load %arg2[%c0_15, %c0_16] : memref<5x128xf32, #tpu.memory_space<vmem>>, vector<1x128xf32>
    %c1 = arith.constant 1 : index
    %c0_17 = arith.constant 0 : index
    %21 = vector.load %arg2[%c1, %c0_17] : memref<5x128xf32, #tpu.memory_space<vmem>>, vector<1x128xf32>
    %22 = vector.broadcast %13 : vector<1x128xf32> to vector<8x128xf32>
    %23 = arith.subf %6, %22 : vector<8x128xf32>
    %cst_18 = arith.constant 9.99999974E-6 : f32
    %24 = vector.broadcast %cst_18 : f32 to vector<1x128xf32>
    %25 = arith.addf %19, %24 : vector<1x128xf32>
    %26 = math.rsqrt %25 : vector<1x128xf32>
    %27 = vector.broadcast %26 : vector<1x128xf32> to vector<8x128xf32>
    %28 = arith.mulf %23, %27 : vector<8x128xf32>
    %29 = vector.broadcast %20 : vector<1x128xf32> to vector<8x128xf32>
    %30 = arith.mulf %29, %28 : vector<8x128xf32>
    %31 = vector.broadcast %21 : vector<1x128xf32> to vector<8x128xf32>
    %32 = arith.addf %30, %31 : vector<8x128xf32>
    %cst_19 = arith.constant 0.000000e+00 : f32
    %33 = vector.broadcast %cst_19 : f32 to vector<8x128xf32>
    %34 = arith.maximumf %32, %33 : vector<8x128xf32>
    %c0_20 = arith.constant 0 : index
    %c128 = arith.constant 128 : index
    %35 = vector.load %arg4[%c0_20, %c128] : memref<8x384xf32, #tpu.memory_space<vmem>>, vector<8x128xf32>
    tpu.vector_store %arg4[%c0_20, %c128], %34 {strides = array<i32>} : memref<8x384xf32, #tpu.memory_space<vmem>>, vector<8x128xf32>,
    %c0_21 = arith.constant 0 : index
    %c0_22 = arith.constant 0 : index
    %36 = vector.load %arg4[%c0_21, %c0_22] : memref<8x384xf32, #tpu.memory_space<vmem>>, vector<8x256xf32>
    %c0_23 = arith.constant 0 : index
    %c128_24 = arith.constant 128 : index
    %37 = vector.load %arg1[%c0_23, %c128_24] : memref<384x384xf32, #tpu.memory_space<vmem>>, vector<256x128xf32>
    %cst_25 = arith.constant dense<0.000000e+00> : vector<8x128xf32>
    %38 = tpu.matmul %36, %37, %cst_25 {dimension_numbers = #tpu.dot_dimension_numbers<[1], [0], [0], [1], [0, 0, 1, 1], [], []>} : vector<8x256xf32>, vector<256x128xf32>, vector<8x128xf32> -> vector<8x128xf32>
    %cst_26 = arith.constant dense<0.000000e+00> : vector<128xf32>
    %39 = vector.multi_reduction <add>, %38, %cst_26 [0] : vector<8x128xf32> to vector<128xf32>
    %40 = vector.shape_cast %39 : vector<128xf32> to vector<1x128xf32>
    %41 = arith.mulf %38, %38 : vector<8x128xf32>
    %cst_27 = arith.constant dense<0.000000e+00> : vector<128xf32>
    %42 = vector.multi_reduction <add>, %41, %cst_27 [0] : vector<8x128xf32> to vector<128xf32>
    %43 = vector.shape_cast %42 : vector<128xf32> to vector<1x128xf32>
    %cst_28 = arith.constant 1.250000e-01 : f32
    %44 = vector.broadcast %cst_28 : f32 to vector<1x128xf32>
    %45 = arith.mulf %40, %44 : vector<1x128xf32>
    %cst_29 = arith.constant 1.250000e-01 : f32
    %46 = vector.broadcast %cst_29 : f32 to vector<1x128xf32>
    %47 = arith.mulf %43, %46 : vector<1x128xf32>
    %48 = arith.mulf %45, %45 : vector<1x128xf32>
    %49 = arith.subf %47, %48 : vector<1x128xf32>
    %cst_30 = arith.constant 0.000000e+00 : f32
    %50 = vector.broadcast %cst_30 : f32 to vector<1x128xf32>
    %51 = arith.maximumf %49, %50 : vector<1x128xf32>
    %c2 = arith.constant 2 : index
    %c0_31 = arith.constant 0 : index
    %52 = vector.load %arg2[%c2, %c0_31] : memref<5x128xf32, #tpu.memory_space<vmem>>, vector<1x128xf32>
    %c3 = arith.constant 3 : index
    %c0_32 = arith.constant 0 : index
    %53 = vector.load %arg2[%c3, %c0_32] : memref<5x128xf32, #tpu.memory_space<vmem>>, vector<1x128xf32>
    %54 = vector.broadcast %45 : vector<1x128xf32> to vector<8x128xf32>
    %55 = arith.subf %38, %54 : vector<8x128xf32>
    %cst_33 = arith.constant 9.99999974E-6 : f32
    %56 = vector.broadcast %cst_33 : f32 to vector<1x128xf32>
    %57 = arith.addf %51, %56 : vector<1x128xf32>
    %58 = math.rsqrt %57 : vector<1x128xf32>
    %59 = vector.broadcast %58 : vector<1x128xf32> to vector<8x128xf32>
    %60 = arith.mulf %55, %59 : vector<8x128xf32>
    %61 = vector.broadcast %52 : vector<1x128xf32> to vector<8x128xf32>
    %62 = arith.mulf %61, %60 : vector<8x128xf32>
    %63 = vector.broadcast %53 : vector<1x128xf32> to vector<8x128xf32>
    %64 = arith.addf %62, %63 : vector<8x128xf32>
    %cst_34 = arith.constant 0.000000e+00 : f32
    %65 = vector.broadcast %cst_34 : f32 to vector<8x128xf32>
    %66 = arith.maximumf %64, %65 : vector<8x128xf32>
    %c0_35 = arith.constant 0 : index
    %c256 = arith.constant 256 : index
    %67 = vector.load %arg4[%c0_35, %c256] : memref<8x384xf32, #tpu.memory_space<vmem>>, vector<8x128xf32>
    tpu.vector_store %arg4[%c0_35, %c256], %66 {strides = array<i32>} : memref<8x384xf32, #tpu.memory_space<vmem>>, vector<8x128xf32>,
    %c0_36 = arith.constant 0 : index
    %c0_37 = arith.constant 0 : index
    %68 = vector.load %arg4[%c0_36, %c0_37] : memref<8x384xf32, #tpu.memory_space<vmem>>, vector<8x384xf32>
    %c0_38 = arith.constant 0 : index
    %c256_39 = arith.constant 256 : index
    %69 = vector.load %arg1[%c0_38, %c256_39] : memref<384x384xf32, #tpu.memory_space<vmem>>, vector<384x128xf32>
    %cst_40 = arith.constant dense<0.000000e+00> : vector<8x128xf32>
    %70 = tpu.matmul %68, %69, %cst_40 {dimension_numbers = #tpu.dot_dimension_numbers<[1], [0], [0], [1], [0, 0, 1, 1], [], []>} : vector<8x384xf32>, vector<384x128xf32>, vector<8x128xf32> -> vector<8x128xf32>
    %c4 = arith.constant 4 : index
    %c0_41 = arith.constant 0 : index
    %71 = vector.load %arg2[%c4, %c0_41] : memref<5x128xf32, #tpu.memory_space<vmem>>, vector<1x128xf32>
    %72 = vector.broadcast %71 : vector<1x128xf32> to vector<8x128xf32>
    %73 = arith.addf %70, %72 : vector<8x128xf32>
    %74 = vector.extract_strided_slice %73 {offsets = [0, 0], sizes = [8, 16], strides = [1, 1]} : vector<8x128xf32> to vector<8x16xf32>
    %c0_42 = arith.constant 0 : index
    %c0_43 = arith.constant 0 : index
    %75 = vector.load %arg3[%c0_42, %c0_43] : memref<8x16xf32, #tpu.memory_space<vmem>>, vector<8x16xf32>
    tpu.vector_store %arg3[%c0_42, %c0_43], %74 {strides = array<i32>} : memref<8x16xf32, #tpu.memory_space<vmem>>, vector<8x16xf32>,
    return
  }
}

</mosaic_0001>

<bundles_post_ra>
// kernel: _forward.1
= control target key start
LH: loop header
LB: loop body
LE: loop exit
PB: predicated region body
PF: predicated region fallthrough
CT: control target
= control target key end

     0   :  { %8 = vsyncpa [#allocation4], 0  ;;  %s892_s0 = inlined_call_operand.hbm [shape: f32[8,32], index: 0, kind: input, shape index: {}]   ;;  %s893_s1 = inlined_call_operand.hbm [shape: f32[384,384], index: 1, kind: input, shape index: {}]   ;;  %s894_s2 = inlined_call_operand.hbm [shape: f32[5,128], index: 2, kind: input, shape index: {}]   ;;  %s895_s3 = inlined_call_operand.hbm [shape: f32[8,16], index: 3, kind: output, shape index: {}]  }
   0x1   :  { %9 = vsyncpa [#allocation7], 0 }
   0x2   :  { %10 = vsyncpa [#allocation5], 0  ;;  %s810_s12 = smov [#allocation6]  }
   0x3   :  { %s26_s13 = sshll.u32 %s810_s12, 4  ;;  %s27_s13 = int_to_ptr.vmem [resolvable:$true] %s26_s13 }
   0x4   :  { %s732_s14 = scalar_lea.vmem %s27_s13, 18432  ;;  %p737_p1 = scmp.lt.s32.totalorder %s27_s13, %s27_s13 }
   0x5   :  { %p733_p0 = scmp.ne.s32.totalorder %s27_s13, %s732_s14  ;;  %p738_p2 = scmp.lt.s32.totalorder %s732_s14, %s732_s14 }
   0x7   :  { %p739_p3 = por %p738_p2, %p737_p1 }
   0x9   :  { %p740_p4 = pnand %p739_p3, %p733_p0 }
   0xb   :  { %743 = shalt.err (!%p740_p4)
}
   0xc   :  { %s811_s15 = smov 384   ;;  %s812_s16 = smov 24  }
   0xd   :  { %32 = dma.hbm_to_vmem [thread:$0]  %s893_s1, 18432, %s27_s13, [#allocation7], %s811_s15, %s811_s15, %s812_s16  }
   0xe   :  { %s813_s19 = smov [#allocation3]   ;;  %s814_s21 = smov [#allocation8]  }
   0xf   :  { %s17_s20 = sshll.u32 %s813_s19, 4  ;;  %s39_s22 = sshll.u32 %s814_s21, 4  ;;  %s18_s20 = int_to_ptr.vmem [resolvable:$true] %s17_s20  ;;  %s40_s22 = int_to_ptr.vmem [resolvable:$true] %s39_s22 }
  0x10   :  { %s752_s23 = scalar_lea.vmem %s18_s20, 128  ;;  %p757_p6 = scmp.lt.s32.totalorder %s18_s20, %s18_s20 }
  0x11   :  { %p753_p5 = scmp.ne.s32.totalorder %s18_s20, %s752_s23  ;;  %p758_p7 = scmp.lt.s32.totalorder %s752_s23, %s752_s23 }
  0x13   :  { %p759_p8 = por %p758_p7, %p757_p6 }
  0x15   :  { %p760_p9 = pnand %p759_p8, %p753_p5 }
  0x17   :  { %763 = shalt.err (!%p760_p9)
}
  0x18   :  { %20 = dma.hbm_to_vmem [thread:$0]  %s892_s0, 128, %s18_s20, [#allocation4]  }
  0x19   :  { %s772_s26 = scalar_lea.vmem %s40_s22, 128  ;;  %p777_p11 = scmp.lt.s32.totalorder %s40_s22, %s40_s22 }
  0x1a   :  { %p773_p10 = scmp.ne.s32.totalorder %s40_s22, %s772_s26  ;;  %p778_p12 = scmp.lt.s32.totalorder %s772_s26, %s772_s26 }
  0x1c   :  { %p779_p13 = por %p778_p12, %p777_p11 }
  0x1e   :  { %p780_p0 = pnand %p779_p13, %p773_p10 }
  0x20   :  { %783 = shalt.err (!%p780_p0)
}
  0x21   :  { %42 = dma.hbm_to_vmem [thread:$0]  %s894_s2, 128, %s40_s22, [#allocation7]  }
  0x22   :  { %804 = dma.done.wait [#allocation4], 128  }
  0x23   :  { %805 = vsyncadd [#allocation4], 4294967168 }
  0x24   :  { %806 = dma.done.wait [#allocation7], 18560  }
  0x25   :  { %807 = vsyncadd [#allocation7], 4294948736  ;;  %v815_v0 = vmov 0.0   ;;  %vm816_vm0 = vmmov 0   ;;  %v72_v1 = vld [vmem:[#allocation6 + $0x168] sm:$0xff]  ;;  %v71_v2 = vld [vmem:[#allocation6 + $0x150] sm:$0xff] }
  0x26   :  { %642 = vmatprep.subr.mxu0 %v815_v0  ;;  %52 = vst [vmem:[#allocation2] sm:$0xff] %v815_v0  ;;  %674 = vmatprep.mubr.msk.f32.mxu0 %vm816_vm0, %v815_v0  ;;  %v70_v3 = vld [vmem:[#allocation6 + $0x138] sm:$0xff]  ;;  %vm54_vm1 = vcmask 261120   ;;  %v69_v4 = vld [vmem:[#allocation6 + $0x120] sm:$0xff]  ;;  %v68_v6 = vld [vmem:[#allocation6 + $0x108] sm:$0xff]  ;;  %s817_s0 = smov [#allocation9]  }
  0x27   :  { %643 = vmatpush3.msra.mxu0 %v72_v1  ;;  %v53_v5 = vld [vmem:[#allocation3] sm:$0xff]  ;;  %v67_v7 = vld [vmem:[#allocation6 + $0xf0] sm:$0xff]  ;;  %v65_v9 = vld [vmem:[#allocation6 + $0xc0] sm:$0xff]  ;;  %s523_s2 = sshll.u32 %s817_s0, 4  ;;  %vm515_vm2 = vcmask 130048   ;;  %s524_s2 = int_to_ptr.vmem [resolvable:$true] %s523_s2 }
  0x28   :  { %644 = vmatprep.subr.mxu0 %v815_v0  ;;  %55 = vst.msk [vmem:[#allocation2] sm:$0xff] %vm54_vm1, %v53_v5  ;;  %v66_v8 = vld [vmem:[#allocation6 + $0xd8] sm:$0xff]  ;;  %v64_v10 = vld [vmem:[#allocation6 + $0xa8] sm:$0xff]  ;;  %v63_v11 = vld [vmem:[#allocation6 + $0x90] sm:$0xff]  ;;  %s784_s28 = scalar_lea.vmem %s524_s2, 128  ;;  %p789_p2 = scmp.lt.s32.totalorder %s524_s2, %s524_s2 }
  0x29   :  { %645 = vmatpush3.msra.mxu0 %v71_v2  ;;  %v62_v12 = vld [vmem:[#allocation6 + $0x78] sm:$0xff]  ;;  %v61_v13 = vld [vmem:[#allocation6 + $0x60] sm:$0xff]  ;;  %v60_v14 = vld [vmem:[#allocation6 + $0x48] sm:$0xff]  ;;  %p785_p1 = scmp.ne.s32.totalorder %s524_s2, %s784_s28  ;;  %p790_p3 = scmp.lt.s32.totalorder %s784_s28, %s784_s28 }
  0x2a   :  { %646 = vmatprep.subr.mxu0 %v815_v0  ;;  %v59_v15 = vld [vmem:[#allocation6 + $0x30] sm:$0xff]  ;;  %v58_v16 = vld [vmem:[#allocation6 + $0x18] sm:$0xff]  ;;  %v57_v17 = vld [vmem:[#allocation6] sm:$0xff] }
  0x2b   :  { %647 = vmatpush3.msra.mxu0 %v70_v3  ;;  %v212_v19 = vld [vmem:[#allocation6 + $0x2f0] sm:$0xff]  ;;  %v211_v21 = vld [vmem:[#allocation6 + $0x2d8] sm:$0xff]  ;;  %v210_v23 = vld [vmem:[#allocation6 + $0x2c0] sm:$0xff]  ;;  %p791_p4 = por %p790_p3, %p789_p2 }
  0x2c   :  { %648 = vmatprep.subr.mxu0 %v815_v0  ;;  %555 = vmatprep.subr.mxu1 %v212_v19  ;;  %v196_v20 = vld [vmem:[#allocation6 + $0x170] sm:$0xff]  ;;  %v195_v22 = vld [vmem:[#allocation6 + $0x158] sm:$0xff]  ;;  %v194_v24 = vld [vmem:[#allocation6 + $0x140] sm:$0xff] }
  0x2d   :  { %649 = vmatpush3.msra.mxu0 %v69_v4  ;;  %556 = vmatpush3.msra.mxu1 %v196_v20  ;;  %v209_v25 = vld [vmem:[#allocation6 + $0x2a8] sm:$0xff]  ;;  %v208_v27 = vld [vmem:[#allocation6 + $0x290] sm:$0xff]  ;;  %v207_v29 = vld [vmem:[#allocation6 + $0x278] sm:$0xff]  ;;  %p792_p5 = pnand %p791_p4, %p785_p1 }
  0x2e   :  { %650 = vmatprep.subr.mxu0 %v815_v0  ;;  %557 = vmatprep.subr.mxu1 %v211_v21  ;;  %v193_v26 = vld [vmem:[#allocation6 + $0x128] sm:$0xff]  ;;  %v192_v28 = vld [vmem:[#allocation6 + $0x110] sm:$0xff]  ;;  %v191_v30 = vld [vmem:[#allocation6 + $0xf8] sm:$0xff] }
  0x2f   :  { %651 = vmatpush3.msra.mxu0 %v68_v6  ;;  %v865_v18 = vld [vmem:[#allocation2] sm:$0xff]  ;;  %558 = vmatpush3.msra.mxu1 %v195_v22  ;;  %v205_v33 = vld [vmem:[#allocation6 + $0x248] sm:$0xff]  ;;  %v204_v35 = vld [vmem:[#allocation6 + $0x230] sm:$0xff] }
  0x30   :  { %652 = vmatprep.subr.mxu0 %v815_v0  ;;  %559 = vmatprep.subr.mxu1 %v210_v23  ;;  %v206_v31 = vld [vmem:[#allocation6 + $0x260] sm:$0xff]  ;;  %v189_v34 = vld [vmem:[#allocation6 + $0xc8] sm:$0xff]  ;;  %v188_v36 = vld [vmem:[#allocation6 + $0xb0] sm:$0xff] }
  0x31   :  { %653 = vmatpush3.msra.mxu0 %v67_v7  ;;  %560 = vmatpush3.msra.mxu1 %v194_v24  ;;  %v190_v32 = vld [vmem:[#allocation6 + $0xe0] sm:$0xff]  ;;  %v203_v37 = vld [vmem:[#allocation6 + $0x218] sm:$0xff]  ;;  %v201_v41 = vld [vmem:[#allocation6 + $0x1e8] sm:$0xff] }
  0x32   :  { %654 = vmatprep.subr.mxu0 %v815_v0  ;;  %561 = vmatprep.subr.mxu1 %v209_v25  ;;  %v187_v38 = vld [vmem:[#allocation6 + $0x98] sm:$0xff]  ;;  %v202_v39 = vld [vmem:[#allocation6 + $0x200] sm:$0xff]  ;;  %v185_v42 = vld [vmem:[#allocation6 + $0x68] sm:$0xff] }
  0x33   :  { %655 = vmatpush3.msra.mxu0 %v66_v8  ;;  %562 = vmatpush3.msra.mxu1 %v193_v26  ;;  %v186_v40 = vld [vmem:[#allocation6 + $0x80] sm:$0xff]  ;;  %v200_v43 = vld [vmem:[#allocation6 + $0x1d0] sm:$0xff]  ;;  %v199_v45 = vld [vmem:[#allocation6 + $0x1b8] sm:$0xff] }
  0x34   :  { %656 = vmatprep.subr.mxu0 %v815_v0  ;;  %563 = vmatprep.subr.mxu1 %v208_v27  ;;  %v184_v44 = vld [vmem:[#allocation6 + $0x50] sm:$0xff]  ;;  %v183_v46 = vld [vmem:[#allocation6 + $0x38] sm:$0xff]  ;;  %v198_v47 = vld [vmem:[#allocation6 + $0x1a0] sm:$0xff] }
  0x35   :  { %657 = vmatpush3.msra.mxu0 %v65_v9  ;;  %564 = vmatpush3.msra.mxu1 %v192_v28  ;;  %v182_v48 = vld [vmem:[#allocation6 + $0x20] sm:$0xff]  ;;  %v197_v49 = vld [vmem:[#allocation6 + $0x188] sm:$0xff]  ;;  %v337_v19 = vld [vmem:[#allocation6 + $0x178] sm:$0xff] }
  0x36   :  { %658 = vmatprep.subr.mxu0 %v815_v0  ;;  %565 = vmatprep.subr.mxu1 %v207_v29  ;;  %v181_v50 = vld [vmem:[#allocation6 + $0x8] sm:$0xff]  ;;  %v352_v20 = vld [vmem:[#allocation6 + $0x2e0] sm:$0xff]  ;;  %v350_v24 = vld [vmem:[#allocation6 + $0x2b0] sm:$0xff] }
  0x37   :  { %659 = vmatpush3.msra.mxu0 %v64_v10  ;;  %566 = vmatpush3.msra.mxu1 %v191_v30  ;;  %v336_v21 = vld [vmem:[#allocation6 + $0x160] sm:$0xff]  ;;  %v351_v22 = vld [vmem:[#allocation6 + $0x2c8] sm:$0xff]  ;;  %v334_v25 = vld [vmem:[#allocation6 + $0x130] sm:$0xff] }
  0x38   :  { %660 = vmatprep.subr.mxu0 %v815_v0  ;;  %567 = vmatprep.subr.mxu1 %v206_v31  ;;  %v335_v23 = vld [vmem:[#allocation6 + $0x148] sm:$0xff]  ;;  %v349_v26 = vld [vmem:[#allocation6 + $0x298] sm:$0xff]  ;;  %v348_v29 = vld [vmem:[#allocation6 + $0x280] sm:$0xff] }
  0x39   :  { %661 = vmatpush3.msra.mxu0 %v63_v11  ;;  %568 = vmatpush3.msra.mxu1 %v190_v32  ;;  %v533_v11 = vld [vmem:[#allocation8] ss:$0 sm:$0xff]  ;;  %v333_v27 = vld [vmem:[#allocation6 + $0x118] sm:$0xff]  ;;  %v347_v32 = vld [vmem:[#allocation6 + $0x268] sm:$0xff] }
  0x3a   :  { %662 = vmatprep.subr.mxu0 %v815_v0  ;;  %569 = vmatprep.subr.mxu1 %v205_v33  ;;  %v369_v28 = vld [vmem:[#allocation6 + $0x478] sm:$0xff]  ;;  %v332_v30 = vld [vmem:[#allocation6 + $0x100] sm:$0xff]  ;;  %v331_v33 = vld [vmem:[#allocation6 + $0xe8] sm:$0xff] }
  0x3b   :  { %663 = vmatpush3.msra.mxu0 %v62_v12  ;;  %570 = vmatpush3.msra.mxu1 %v189_v34  ;;  %v368_v31 = vld [vmem:[#allocation6 + $0x460] sm:$0xff]  ;;  %v367_v34 = vld [vmem:[#allocation6 + $0x448] sm:$0xff] }
  0x3c   :  { %664 = vmatprep.subr.mxu0 %v815_v0  ;;  %571 = vmatprep.subr.mxu1 %v204_v35  ;;  %v346_v35 = vld [vmem:[#allocation6 + $0x250] sm:$0xff] }
  0x3d   :  { %665 = vmatpush3.msra.mxu0 %v61_v13  ;;  %572 = vmatpush3.msra.mxu1 %v188_v36  ;;  %v534_v13 = vld [vmem:[#allocation8 + $0x1] ss:$0 sm:$0xff]  ;;  %v330_v36 = vld [vmem:[#allocation6 + $0xd0] sm:$0xff] }
  0x3e   :  { %666 = vmatprep.subr.mxu0 %v815_v0  ;;  %573 = vmatprep.subr.mxu1 %v203_v37  ;;  %v366_v37 = vld [vmem:[#allocation6 + $0x430] sm:$0xff] }
  0x3f   :  { %667 = vmatpush3.msra.mxu0 %v60_v14  ;;  %574 = vmatpush3.msra.mxu1 %v187_v38  ;;  %v345_v38 = vld [vmem:[#allocation6 + $0x238] sm:$0xff] }
  0x40   :  { %668 = vmatprep.subr.mxu0 %v815_v0  ;;  %575 = vmatprep.subr.mxu1 %v202_v39  ;;  %v329_v39 = vld [vmem:[#allocation6 + $0xb8] sm:$0xff] }
  0x41   :  { %669 = vmatpush3.msra.mxu0 %v59_v15  ;;  %576 = vmatpush3.msra.mxu1 %v186_v40  ;;  %v365_v40 = vld [vmem:[#allocation6 + $0x418] sm:$0xff] }
  0x42   :  { %670 = vmatprep.subr.mxu0 %v815_v0  ;;  %577 = vmatprep.subr.mxu1 %v201_v41  ;;  %v344_v41 = vld [vmem:[#allocation6 + $0x220] sm:$0xff] }
  0x43   :  { %671 = vmatpush3.msra.mxu0 %v58_v16  ;;  %578 = vmatpush3.msra.mxu1 %v185_v42  ;;  %v328_v42 = vld [vmem:[#allocation6 + $0xa0] sm:$0xff] }
  0x44   :  { %672 = vmatprep.subr.mxu0 %v815_v0  ;;  %579 = vmatprep.subr.mxu1 %v200_v43  ;;  %v364_v43 = vld [vmem:[#allocation6 + $0x400] sm:$0xff] }
  0x45   :  { %673 = vmatpush3.msra.mxu0 %v57_v17  ;;  %580 = vmatpush3.msra.mxu1 %v184_v44  ;;  %v353_v17 = vld [vmem:[#allocation6 + $0x2f8] sm:$0xff]  ;;  %v343_v44 = vld [vmem:[#allocation6 + $0x208] sm:$0xff] }
  0x46   :  { %675 = vmatmul.mubr.f32.vlgmr.msra.gmra.mxu0 %v865_v18  ;;  %581 = vmatprep.subr.mxu1 %v199_v45  ;;  %v327_v45 = vld [vmem:[#allocation6 + $0x88] sm:$0xff] }
  0x47   :  { %582 = vmatpush3.msra.mxu1 %v183_v46  ;;  %590 = vmatprep.subr.mxu0 %v353_v17  ;;  %v363_v46 = vld [vmem:[#allocation6 + $0x3e8] sm:$0xff] }
  0x48   :  { %583 = vmatprep.subr.mxu1 %v198_v47  ;;  %591 = vmatpush3.msra.mxu0 %v337_v19  ;;  %v342_v47 = vld [vmem:[#allocation6 + $0x1f0] sm:$0xff] }
  0x49   :  { %584 = vmatpush3.msra.mxu1 %v182_v48  ;;  %592 = vmatprep.subr.mxu0 %v352_v20  ;;  %v326_v48 = vld [vmem:[#allocation6 + $0x70] sm:$0xff] }
  0x4a   :  { %585 = vmatprep.subr.mxu1 %v197_v49  ;;  %593 = vmatpush3.msra.mxu0 %v336_v21  ;;  %v362_v49 = vld [vmem:[#allocation6 + $0x3d0] sm:$0xff] }
  0x4b   :  { %586 = vmatpush3.msra.mxu1 %v181_v50  ;;  %594 = vmatprep.subr.mxu0 %v351_v22  ;;  %v341_v50 = vld [vmem:[#allocation6 + $0x1d8] sm:$0xff] }
  0x4c   :  { %677 = vmatprep.subr.mxu1 %v815_v0  ;;  %595 = vmatpush3.msra.mxu0 %v335_v23 }
  0x4d   :  { %596 = vmatprep.subr.mxu0 %v350_v24 }
  0x4e   :  { %597 = vmatpush3.msra.mxu0 %v334_v25 }
  0x4f   :  { %598 = vmatprep.subr.mxu0 %v349_v26  ;;  %v535_v26 = vld [vmem:[#allocation8 + $0x2] ss:$0 sm:$0xff] }
  0x50   :  { %599 = vmatpush3.msra.mxu0 %v333_v27 }
  0x51   :  { %600 = vmatprep.subr.mxu0 %v348_v29 }
  0x52   :  { %601 = vmatpush3.msra.mxu0 %v332_v30 }
  0x53   :  { %602 = vmatprep.subr.mxu0 %v347_v32 }
  0x54   :  { %603 = vmatpush3.msra.mxu0 %v331_v33 }
  0x55   :  { %604 = vmatprep.subr.mxu0 %v346_v35  ;;  %v537_v35 = vld [vmem:[#allocation8 + $0x4] ss:$0 sm:$0xff] }
  0x56   :  { %605 = vmatpush3.msra.mxu0 %v330_v36 }
  0x57   :  { %606 = vmatprep.subr.mxu0 %v345_v38 }
  0x58   :  { %607 = vmatpush3.msra.mxu0 %v329_v39 }
  0x59   :  { %608 = vmatprep.subr.mxu0 %v344_v41 }
  0x5a   :  { %609 = vmatpush3.msra.mxu0 %v328_v42 }
  0x5b   :  { %610 = vmatprep.subr.mxu0 %v343_v44 }
  0x5c   :  { %611 = vmatpush3.msra.mxu0 %v327_v45 }
  0x5d   :  { %612 = vmatprep.subr.mxu0 %v342_v47 }
  0x5e   :  { %613 = vmatpush3.msra.mxu0 %v326_v48 }
  0x5f   :  { %614 = vmatprep.subr.mxu0 %v341_v50 }
 0x106   :  { %v139_v51 = vpop.f32.mrf.mxu0 }
 0x107   :  { %v143_v52 = vrot.slane %v139_v51, 4  ;;  %v149_v53 = vmul.f32 %v139_v51, %v139_v51 }
 0x108   :  { %v676_v54 = vpop.f32.mrf.mxu0 }
 0x109   :  { %v144_v55 = vadd.f32 %v143_v52, %v139_v51  ;;  %v150_v56 = vrot.slane %v149_v53, 4  ;;  %v361_v52 = vld [vmem:[#allocation6 + $0x3b8] sm:$0xff]  ;;  %v324_v54 = vld [vmem:[#allocation6 + $0x40] sm:$0xff] }
 0x10b   :  { %v145_v57 = vrot.slane %v144_v55, 2  ;;  %v151_v58 = vadd.f32 %v150_v56, %v149_v53  ;;  %v340_v53 = vld [vmem:[#allocation6 + $0x1c0] sm:$0xff]  ;;  %v339_v56 = vld [vmem:[#allocation6 + $0x1a8] sm:$0xff] }
 0x10d   :  { %v146_v59 = vadd.f32 %v145_v57, %v144_v55  ;;  %v152_v60 = vrot.slane %v151_v58, 2  ;;  %v360_v55 = vld [vmem:[#allocation6 + $0x3a0] sm:$0xff]  ;;  %v323_v57 = vld [vmem:[#allocation6 + $0x28] sm:$0xff] }
 0x10f   :  { %v147_v61 = vrot.slane %v146_v59, 1  ;;  %v153_v62 = vadd.f32 %v152_v60, %v151_v58  ;;  %v359_v58 = vld [vmem:[#allocation6 + $0x388] sm:$0xff]  ;;  %v322_v60 = vld [vmem:[#allocation6 + $0x10] sm:$0xff] }
 0x111   :  { %v148_v63 = vadd.f32 %v147_v61, %v146_v59  ;;  %v154_v1 = vrot.slane %v153_v62, 1  ;;  %v338_v59 = vld [vmem:[#allocation6 + $0x190] sm:$0xff] }
 0x112   :  { %v358_v61 = vld [vmem:[#allocation6 + $0x370] sm:$0xff] }
 0x113   :  { %v155_v2 = vadd.f32 %v154_v1, %v153_v62  ;;  %v156_v3 = vmul.f32 0.125, %v148_v63  ;;  %v357_v62 = vld [vmem:[#allocation6 + $0x358] sm:$0xff]  ;;  %v356_v63 = vld [vmem:[#allocation6 + $0x340] sm:$0xff]  ;;  %v355_v1 = vld [vmem:[#allocation6 + $0x328] sm:$0xff] }
 0x115   :  { %v157_v4 = vmul.f32 0.125, %v155_v2  ;;  %v158_v5 = vmul.f32 %v156_v3, %v156_v3  ;;  %v163_v9 = vsub.f32 %v139_v51, %v156_v3  ;;  %v325_v51 = vld [vmem:[#allocation6 + $0x58] sm:$0xff]  ;;  %v354_v2 = vld [vmem:[#allocation6 + $0x310] sm:$0xff] }
 0x116   :  { %615 = vmatpush3.msra.mxu0 %v325_v51 }
 0x117   :  { %v159_v6 = vsub.f32 %v157_v4, %v158_v5  ;;  %616 = vmatprep.subr.mxu0 %v340_v53 }
 0x118   :  { %617 = vmatpush3.msra.mxu0 %v324_v54 }
 0x119   :  { %v160_v7 = vmax.f32 %v159_v6, 0.0  ;;  %618 = vmatprep.subr.mxu0 %v339_v56 }
 0x11a   :  { %619 = vmatpush3.msra.mxu0 %v323_v57 }
 0x11b   :  { %v164_v8 = vadd.f32 1e-05, %v160_v7  ;;  %620 = vmatprep.subr.mxu0 %v338_v59 }
 0x11c   :  { %621 = vmatpush3.msra.mxu0 %v322_v60 }
 0x11d   :  { %720 = vrsqrt.f32 %v164_v8 }
 0x12a   :  { %v721_v10 = vpop.eup %720 }
 0x12b   :  { %v166_v12 = vmul.f32 %v721_v10, %v163_v9 }
 0x12d   :  { %v171_v14 = vmul.f32 %v533_v11, %v166_v12 }
 0x12f   :  { %v176_v15 = vadd.f32 %v534_v13, %v171_v14 }
 0x131   :  { %v177_v16 = vmax.f32 %v176_v15, 0.0 }
 0x133   :  { %277 = vmatprep.mubr.f32.mxu1 %v177_v16  ;;  %439 = vmatprep.mubr.f32.mxu0 %v177_v16 }
 0x134   :  { %278 = vmatmul.mubr.f32.vlgmr.msra.gmra.mxu1 %v865_v18  ;;  %440 = vmatmul.mubr.f32.vlgmr.msra.gmra.mxu0 %v865_v18 }
 0x135   :  { %709 = vmatprep.mubr.msk.f32.mxu1 %vm816_vm0, %v815_v0  ;;  %678 = vmatpush3.msra.mxu1 %v369_v28  ;;  %v536_v28 = vld [vmem:[#allocation8 + $0x3] ss:$0 sm:$0xff] }
 0x136   :  { %679 = vmatprep.subr.mxu1 %v815_v0 }
 0x137   :  { %680 = vmatpush3.msra.mxu1 %v368_v31 }
 0x138   :  { %681 = vmatprep.subr.mxu1 %v815_v0 }
 0x139   :  { %682 = vmatpush3.msra.mxu1 %v367_v34 }
 0x13a   :  { %683 = vmatprep.subr.mxu1 %v815_v0 }
 0x13b   :  { %684 = vmatpush3.msra.mxu1 %v366_v37 }
 0x13c   :  { %685 = vmatprep.subr.mxu1 %v815_v0 }
 0x13d   :  { %686 = vmatpush3.msra.mxu1 %v365_v40 }
 0x13e   :  { %687 = vmatprep.subr.mxu1 %v815_v0 }
 0x13f   :  { %688 = vmatpush3.msra.mxu1 %v364_v43 }
 0x140   :  { %689 = vmatprep.subr.mxu1 %v815_v0 }
 0x141   :  { %690 = vmatpush3.msra.mxu1 %v363_v46 }
 0x142   :  { %691 = vmatprep.subr.mxu1 %v815_v0 }
 0x143   :  { %692 = vmatpush3.msra.mxu1 %v362_v49 }
 0x144   :  { %693 = vmatprep.subr.mxu1 %v815_v0 }
 0x145   :  { %694 = vmatpush3.msra.mxu1 %v361_v52 }
 0x146   :  { %695 = vmatprep.subr.mxu1 %v815_v0 }
 0x147   :  { %696 = vmatpush3.msra.mxu1 %v360_v55 }
 0x148   :  { %697 = vmatprep.subr.mxu1 %v815_v0 }
 0x149   :  { %698 = vmatpush3.msra.mxu1 %v359_v58 }
 0x14a   :  { %699 = vmatprep.subr.mxu1 %v815_v0 }
 0x14b   :  { %700 = vmatpush3.msra.mxu1 %v358_v61 }
 0x14c   :  { %701 = vmatprep.subr.mxu1 %v815_v0 }
 0x14d   :  { %702 = vmatpush3.msra.mxu1 %v357_v62 }
 0x14e   :  { %703 = vmatprep.subr.mxu1 %v815_v0 }
 0x14f   :  { %704 = vmatpush3.msra.mxu1 %v356_v63 }
 0x150   :  { %705 = vmatprep.subr.mxu1 %v815_v0 }
 0x151   :  { %706 = vmatpush3.msra.mxu1 %v355_v1 }
 0x152   :  { %707 = vmatprep.subr.mxu1 %v815_v0 }
 0x153   :  { %708 = vmatpush3.msra.mxu1 %v354_v2 }
 0x1f4   :  { %v587_v3 = vpop.f32.mrf.mxu1  ;;  %v622_v32 = vpop.f32.mrf.mxu0 }
 0x1f6   :  { %v588_v4 = vpop.f32.mrf.mxu1  ;;  %v623_v33 = vpop.f32.mrf.mxu0 }
 0x1f7   :  { %v589_v5 = vadd.f32 %v588_v4, %v587_v3  ;;  %v624_v34 = vadd.f32 %v623_v33, %v622_v32 }
 0x1f9   :  { %v283_v18 = vrot.slane %v589_v5, 4  ;;  %v289_v6 = vmul.f32 %v589_v5, %v589_v5  ;;  %v442_v36 = vadd.f32 %v624_v34, %v537_v35 }
 0x1fb   :  { %v284_v7 = vadd.f32 %v589_v5, %v283_v18  ;;  %v290_v8 = vrot.slane %v289_v6, 4 }
 0x1fd   :  { %v285_v9 = vrot.slane %v284_v7, 2  ;;  %v291_v10 = vadd.f32 %v290_v8, %v289_v6 }
 0x1ff   :  { %v286_v11 = vadd.f32 %v285_v9, %v284_v7  ;;  %v292_v12 = vrot.slane %v291_v10, 2 }
 0x201   :  { %v287_v13 = vrot.slane %v286_v11, 1  ;;  %v293_v14 = vadd.f32 %v292_v12, %v291_v10 }
 0x203   :  { %v288_v15 = vadd.f32 %v287_v13, %v286_v11  ;;  %v294_v16 = vrot.slane %v293_v14, 1 }
 0x205   :  { %v295_v17 = vadd.f32 %v294_v16, %v293_v14  ;;  %v296_v19 = vmul.f32 0.125, %v288_v15 }
 0x207   :  { %v297_v20 = vmul.f32 0.125, %v295_v17  ;;  %v298_v0 = vmul.f32 %v296_v19, %v296_v19  ;;  %v303_v24 = vsub.f32 %v589_v5, %v296_v19 }
 0x209   :  { %v299_v21 = vsub.f32 %v297_v20, %v298_v0 }
 0x20b   :  { %v300_v22 = vmax.f32 %v299_v21, 0.0 }
 0x20d   :  { %v304_v23 = vadd.f32 1e-05, %v300_v22 }
 0x20f   :  { %722 = vrsqrt.f32 %v304_v23 }
 0x21c   :  { %v723_v25 = vpop.eup %722 }
 0x21d   :  { %v306_v27 = vmul.f32 %v723_v25, %v303_v24 }
 0x21f   :  { %v311_v29 = vmul.f32 %v535_v26, %v306_v27 }
 0x221   :  { %v316_v30 = vadd.f32 %v536_v28, %v311_v29 }
 0x223   :  { %v317_v31 = vmax.f32 %v316_v30, 0.0 }
 0x225   :  { %710 = vmatmul.mubr.f32.vlgmr.msra.gmra.mxu1 %v317_v31 }
 0x2e5   :  { %v511_v37 = vpop.f32.mrf.mxu1 }
 0x2e6   :  { %v512_v38 = vadd.f32 %v511_v37, %v442_v36 }
 0x2e7   :  { %v711_v39 = vpop.f32.mrf.mxu1 }
 0x2e8   :  { %516 = vst.msk [vmem:[#allocation9] sm:$0xff] %vm515_vm2, %v512_v38 }
 0x2e9   :  { %795 = shalt.err (!%p792_p5)
}
 0x2ea   :  { %526 = dma.vmem_to_hbm [thread:$0]  %s524_s2, 128, %s895_s3, [#allocation5]  }
 0x2eb   :  { %808 = dma.done.wait [#allocation5], 128  }
 0x2ec   :  { %809 = vsyncadd [#allocation5], 4294967168 }
 0x2ed   :  { %530 = vsyncpa [#allocation4], 1 }
 0x2ee   :  { %531 = vsyncpa [#allocation7], 1 }
 0x2ef   :  { %532 = vsyncpa [#allocation5], 1 }

</bundles_post_ra>
